<compile_context>
chip_gen: v6e
topology: v6e:2x2x1
jax: 0.10.0
libtpu: 0.0.40
codegen_flags: <defaults>
</compile_context>

<pallas_src>
import jax
import jax.numpy as jnp
from jax.experimental import pallas as pl
from jax.experimental.pallas import tpu as pltpu

IN_DIM = 28 * 28   # 784  (kept un-padded: legal MXU K, padding would add pure bytes)
H1 = 128
H2 = 64
OUT_DIM = 10

H2_PAD = 128       # pad hidden-2 64 -> 128 (lane width, keeps matmul-2/3 lane-dense)
OUT_PAD = 16       # pad logits 10 -> 16 (8x fewer output bytes than 128-lane padding)


def mlp_kernel(x_ref, w1_ref, b1_ref, w2_ref, b2_ref, w3_ref, b3_ref, o_ref):
    # f32 -> bf16 cast happens here (in VMEM, on the VPU) instead of as a separate
    # HBM pass in the wrapper.
    x = x_ref[...].astype(jnp.bfloat16)                                # (TB, 784) bf16

    h1 = jnp.dot(x, w1_ref[...], preferred_element_type=jnp.float32)  # (TB, 128) f32
    h1 = jnp.maximum(h1 + b1_ref[...], 0.0)

    h2 = jnp.dot(h1.astype(jnp.bfloat16), w2_ref[...],
                 preferred_element_type=jnp.float32)                   # (TB, 128) f32
    h2 = jnp.maximum(h2 + b2_ref[...], 0.0)

    o = jnp.dot(h2.astype(jnp.bfloat16), w3_ref[...],
                preferred_element_type=jnp.float32)                    # (TB, 16) f32
    o_ref[...] = o + b3_ref[...]


def _round_up(n, m):
    return ((n + m - 1) // m) * m


def prepare_params(params):
    """One-time weight prep (bf16 cast + zero-pad of the small feature dims).
    Padded weight columns / rows are exactly zero, so padded logits are 0 and are
    sliced off inside the jitted forward — they never escape."""
    w1, b1, w2, b2, w3, b3 = params
    return (
        w1.astype(jnp.bfloat16),
        b1.astype(jnp.float32),
        jnp.pad(w2, ((0, 0), (0, H2_PAD - H2))).astype(jnp.bfloat16),
        jnp.pad(b2, ((0, 0), (0, H2_PAD - H2))).astype(jnp.float32),
        jnp.pad(w3, ((0, H2_PAD - H2), (0, OUT_PAD - OUT_DIM))).astype(jnp.bfloat16),
        jnp.pad(b3, ((0, 0), (0, OUT_PAD - OUT_DIM))).astype(jnp.float32),
    )


def _forward(x_nchw, prepped_params, *, block_b=2048):
    """x_nchw: (B, 1, 28, 28) float32. Returns logits (B, 10) float32."""
    w1b, b1p, w2b, b2p, w3b, b3p = prepped_params
    B = x_nchw.shape[0]

    # Same row-major flatten as torch `x.view(-1, 784)`; stays f32 (cast is in-kernel).
    x = x_nchw.reshape(B, IN_DIM)

    # Batch tile: multiple of 8 sublanes; for non-trivial B aim for >= 2 grid steps so
    # v7x megacore shards the "parallel" axis across both TensorCores; cap at block_b so
    # double-buffered f32 tiles stay inside the 32 MiB scoped-VMEM budget on every gen.
    tb = _round_up(B, 8)
    if tb > 8:
        tb = _round_up(pl.cdiv(B, 2), 8)
    tb = min(tb, block_b)

    B_pad = _round_up(B, tb)
    if B_pad != B:
        x = jnp.pad(x, ((0, B_pad - B), (0, 0)))

    grid = (B_pad // tb,)
    resident = lambda shape: pl.BlockSpec(shape, lambda i: (0, 0))  # stays in VMEM

    flops = 2 * B_pad * (IN_DIM * H1 + H1 * H2_PAD + H2_PAD * OUT_PAD)
    bytes_accessed = (
        B_pad * IN_DIM * 4                                        # x (f32, cast in-kernel)
        + (IN_DIM * H1 + H1 * H2_PAD + H2_PAD * OUT_PAD) * 2      # weights (bf16)
        + (H1 + H2_PAD + OUT_PAD) * 4                             # biases (f32)
        + B_pad * OUT_PAD * 4                                     # output (f32, 16 lanes)
    )

    out = pl.pallas_call(
        mlp_kernel,
        out_shape=jax.ShapeDtypeStruct((B_pad, OUT_PAD), jnp.float32),
        grid=grid,
        in_specs=[
            pl.BlockSpec((tb, IN_DIM), lambda i: (i, 0)),   # x: tiled over the batch
            resident((IN_DIM, H1)),
            resident((1, H1)),
            resident((H1, H2_PAD)),
            resident((1, H2_PAD)),
            resident((H2_PAD, OUT_PAD)),
            resident((1, OUT_PAD)),
        ],
        out_specs=pl.BlockSpec((tb, OUT_PAD), lambda i: (i, 0)),
        compiler_params=pltpu.CompilerParams(
            dimension_semantics=("parallel",),               # megacore on v7x
            vmem_limit_bytes=32 * 1024 * 1024,
        ),
        cost_estimate=pl.CostEstimate(
            flops=flops, transcendentals=0, bytes_accessed=bytes_accessed),
    )(x, w1b, b1p, w2b, b2p, w3b, b3p)

    # Sliced inside the jit so it fuses with the consumer; padded columns (all-zero)
    # never reach user code.
    return out[:B, :OUT_DIM]


simple_mnist_forward = jax.jit(_forward, static_argnames=("block_b",))


def init_params(key):
    """Deterministic init mimicking nn.Linear's U(-1/sqrt(fan_in), +1/sqrt(fan_in)).
    Weights stored as (in_features, out_features): x @ W + b == torch x @ W_t.T + b."""
    ks = jax.random.split(key, 6)

    def linear(kw, kb, fan_in, fan_out):
        bound = 1.0 / jnp.sqrt(float(fan_in))
        w = jax.random.uniform(kw, (fan_in, fan_out), jnp.float32, -bound, bound)
        b = jax.random.uniform(kb, (1, fan_out), jnp.float32, -bound, bound)
        return w, b

    w1, b1 = linear(ks[0], ks[1], IN_DIM, H1)
    w2, b2 = linear(ks[2], ks[3], H1, H2)
    w3, b3 = linear(ks[4], ks[5], H2, OUT_DIM)
    return (w1, b1, w2, b2, w3, b3)


if __name__ == "__main__":
    key = jax.random.PRNGKey(0)
    k_x, k_p = jax.random.split(key)

    B = 2
    x = jax.random.normal(k_x, (B, 1, 28, 28), jnp.float32)  # NCHW like MNIST input
    params = init_params(k_p)
    prepped = prepare_params(params)                          # one-time weight prep

    logits = simple_mnist_forward(x, prepped)
    jax.block_until_ready(logits)
    assert logits.shape == (B, OUT_DIM)

    # Pure-JAX reference with the same bf16-input / f32-accumulate recipe.
    w1, b1, w2, b2, w3, b3 = params
    xf = x.reshape(B, IN_DIM).astype(jnp.bfloat16)
    h1 = jnp.maximum(
        jnp.dot(xf, w1.astype(jnp.bfloat16), preferred_element_type=jnp.float32) + b1, 0.0)
    h2 = jnp.maximum(
        jnp.dot(h1.astype(jnp.bfloat16), w2.astype(jnp.bfloat16),
                preferred_element_type=jnp.float32) + b2, 0.0)
    ref = jnp.dot(h2.astype(jnp.bfloat16), w3.astype(jnp.bfloat16),
                  preferred_element_type=jnp.float32) + b3
    assert jnp.allclose(logits, ref, atol=2e-2, rtol=2e-2)

    # Coarse sanity check against the full-f32 reference (bf16 rounding only).
    h1f = jnp.maximum(x.reshape(B, IN_DIM) @ w1 + b1, 0.0)
    h2f = jnp.maximum(h1f @ w2 + b2, 0.0)
    reff = h2f @ w3 + b3
    assert jnp.allclose(logits, reff, atol=1e-1, rtol=1e-1)

    print("KERNEL_OK")
</pallas_src>

<mosaic_0001>
module attributes {stable_mosaic.version = 11 : i64} {
  func.func @mlp_kernel(%arg0: i32, %arg1: memref<8x784xf32, #tpu.memory_space<vmem>>, %arg2: memref<784x128xbf16, #tpu.memory_space<vmem>>, %arg3: memref<1x128xf32, #tpu.memory_space<vmem>>, %arg4: memref<128x128xbf16, #tpu.memory_space<vmem>>, %arg5: memref<1x128xf32, #tpu.memory_space<vmem>>, %arg6: memref<128x16xbf16, #tpu.memory_space<vmem>>, %arg7: memref<1x16xf32, #tpu.memory_space<vmem>>, %arg8: memref<8x16xf32, #tpu.memory_space<vmem>>) attributes {dimension_semantics = [#tpu.dimension_semantics<parallel>], iteration_bounds = array<i64: 1>, scalar_prefetch = 0 : i64, scratch_operands = 0 : i64, tpu.core_type = #tpu.core_type<tc>, window_params = [{transform_indices = @transform_0, window_bounds = array<i64: 8, 784>}, {pipeline_mode = #tpu.pipeline_mode<synchronous>, transform_indices = @transform_1, window_bounds = array<i64: 784, 128>}, {pipeline_mode = #tpu.pipeline_mode<synchronous>, transform_indices = @transform_2, window_bounds = array<i64: 1, 128>}, {pipeline_mode = #tpu.pipeline_mode<synchronous>, transform_indices = @transform_3, window_bounds = array<i64: 128, 128>}, {pipeline_mode = #tpu.pipeline_mode<synchronous>, transform_indices = @transform_4, window_bounds = array<i64: 1, 128>}, {pipeline_mode = #tpu.pipeline_mode<synchronous>, transform_indices = @transform_5, window_bounds = array<i64: 128, 16>}, {pipeline_mode = #tpu.pipeline_mode<synchronous>, transform_indices = @transform_6, window_bounds = array<i64: 1, 16>}, {transform_indices = @transform_7, window_bounds = array<i64: 8, 16>}]} {
    %c0 = arith.constant 0 : index
    %c0_0 = arith.constant 0 : index
    %0 = vector.load %arg1[%c0, %c0_0] : memref<8x784xf32, #tpu.memory_space<vmem>>, vector<8x784xf32>
    %1 = arith.truncf %0 : vector<8x784xf32> to vector<8x784xbf16>
    %c0_1 = arith.constant 0 : index
    %c0_2 = arith.constant 0 : index
    %2 = vector.load %arg2[%c0_1, %c0_2] : memref<784x128xbf16, #tpu.memory_space<vmem>>, vector<784x128xbf16>
    %cst = arith.constant dense<0.000000e+00> : vector<8x128xf32>
    %3 = tpu.matmul %1, %2, %cst {dimension_numbers = #tpu.dot_dimension_numbers<[1], [0], [0], [1], [0, 0, 1, 1], [], []>} : vector<8x784xbf16>, vector<784x128xbf16>, vector<8x128xf32> -> vector<8x128xf32>
    %c0_3 = arith.constant 0 : index
    %c0_4 = arith.constant 0 : index
    %4 = vector.load %arg3[%c0_3, %c0_4] : memref<1x128xf32, #tpu.memory_space<vmem>>, vector<1x128xf32>
    %5 = vector.broadcast %4 : vector<1x128xf32> to vector<8x128xf32>
    %6 = arith.addf %3, %5 : vector<8x128xf32>
    %cst_5 = arith.constant 0.000000e+00 : f32
    %7 = vector.broadcast %cst_5 : f32 to vector<8x128xf32>
    %8 = arith.maximumf %6, %7 : vector<8x128xf32>
    %9 = arith.truncf %8 : vector<8x128xf32> to vector<8x128xbf16>
    %c0_6 = arith.constant 0 : index
    %c0_7 = arith.constant 0 : index
    %10 = vector.load %arg4[%c0_6, %c0_7] : memref<128x128xbf16, #tpu.memory_space<vmem>>, vector<128x128xbf16>
    %cst_8 = arith.constant dense<0.000000e+00> : vector<8x128xf32>
    %11 = tpu.matmul %9, %10, %cst_8 {dimension_numbers = #tpu.dot_dimension_numbers<[1], [0], [0], [1], [0, 0, 1, 1], [], []>} : vector<8x128xbf16>, vector<128x128xbf16>, vector<8x128xf32> -> vector<8x128xf32>
    %c0_9 = arith.constant 0 : index
    %c0_10 = arith.constant 0 : index
    %12 = vector.load %arg5[%c0_9, %c0_10] : memref<1x128xf32, #tpu.memory_space<vmem>>, vector<1x128xf32>
    %13 = vector.broadcast %12 : vector<1x128xf32> to vector<8x128xf32>
    %14 = arith.addf %11, %13 : vector<8x128xf32>
    %cst_11 = arith.constant 0.000000e+00 : f32
    %15 = vector.broadcast %cst_11 : f32 to vector<8x128xf32>
    %16 = arith.maximumf %14, %15 : vector<8x128xf32>
    %17 = arith.truncf %16 : vector<8x128xf32> to vector<8x128xbf16>
    %c0_12 = arith.constant 0 : index
    %c0_13 = arith.constant 0 : index
    %18 = vector.load %arg6[%c0_12, %c0_13] : memref<128x16xbf16, #tpu.memory_space<vmem>>, vector<128x16xbf16>
    %cst_14 = arith.constant dense<0.000000e+00> : vector<8x16xf32>
    %19 = tpu.matmul %17, %18, %cst_14 {dimension_numbers = #tpu.dot_dimension_numbers<[1], [0], [0], [1], [0, 0, 1, 1], [], []>} : vector<8x128xbf16>, vector<128x16xbf16>, vector<8x16xf32> -> vector<8x16xf32>
    %c0_15 = arith.constant 0 : index
    %c0_16 = arith.constant 0 : index
    %20 = vector.load %arg7[%c0_15, %c0_16] : memref<1x16xf32, #tpu.memory_space<vmem>>, vector<1x16xf32>
    %21 = vector.broadcast %20 : vector<1x16xf32> to vector<8x16xf32>
    %22 = arith.addf %19, %21 : vector<8x16xf32>
    %c0_17 = arith.constant 0 : index
    %c0_18 = arith.constant 0 : index
    %23 = vector.load %arg8[%c0_17, %c0_18] : memref<8x16xf32, #tpu.memory_space<vmem>>, vector<8x16xf32>
    tpu.vector_store %arg8[%c0_17, %c0_18], %22 {strides = array<i32>} : memref<8x16xf32, #tpu.memory_space<vmem>>, vector<8x16xf32>,
    return
  }
  func.func @transform_0(%arg0: i32) -> (i32, i32) {
    %c0_i32 = arith.constant 0 : i32
    %c0_i32_0 = arith.constant 0 : i32
    return %arg0, %c0_i32 : i32, i32
  }
  func.func @transform_1(%arg0: i32) -> (i32, i32) {
    %c0_i32 = arith.constant 0 : i32
    %c0_i32_0 = arith.constant 0 : i32
    %c0_i32_1 = arith.constant 0 : i32
    return %c0_i32, %c0_i32_0 : i32, i32
  }
  func.func @transform_2(%arg0: i32) -> (i32, i32) {
    %c0_i32 = arith.constant 0 : i32
    %c0_i32_0 = arith.constant 0 : i32
    %c0_i32_1 = arith.constant 0 : i32
    return %c0_i32, %c0_i32_0 : i32, i32
  }
  func.func @transform_3(%arg0: i32) -> (i32, i32) {
    %c0_i32 = arith.constant 0 : i32
    %c0_i32_0 = arith.constant 0 : i32
    %c0_i32_1 = arith.constant 0 : i32
    return %c0_i32, %c0_i32_0 : i32, i32
  }
  func.func @transform_4(%arg0: i32) -> (i32, i32) {
    %c0_i32 = arith.constant 0 : i32
    %c0_i32_0 = arith.constant 0 : i32
    %c0_i32_1 = arith.constant 0 : i32
    return %c0_i32, %c0_i32_0 : i32, i32
  }
  func.func @transform_5(%arg0: i32) -> (i32, i32) {
    %c0_i32 = arith.constant 0 : i32
    %c0_i32_0 = arith.constant 0 : i32
    %c0_i32_1 = arith.constant 0 : i32
    return %c0_i32, %c0_i32_0 : i32, i32
  }
  func.func @transform_6(%arg0: i32) -> (i32, i32) {
    %c0_i32 = arith.constant 0 : i32
    %c0_i32_0 = arith.constant 0 : i32
    %c0_i32_1 = arith.constant 0 : i32
    return %c0_i32, %c0_i32_0 : i32, i32
  }
  func.func @transform_7(%arg0: i32) -> (i32, i32) {
    %c0_i32 = arith.constant 0 : i32
    %c0_i32_0 = arith.constant 0 : i32
    return %arg0, %c0_i32 : i32, i32
  }
}

</mosaic_0001>

<bundles_post_ra>
// kernel: _forward.1
= control target key start
LH: loop header
LB: loop body
LE: loop exit
PB: predicated region body
PF: predicated region fallthrough
CT: control target
= control target key end

     0   :  { %12 = vsyncpa [#allocation3], 0  ;;  %s1143_s24 = smov [#allocation2]   ;;  %s1297_s0 = inlined_call_operand.vmem [shape: f32[8,784], index: 0, kind: input, shape index: {}]   ;;  %s1298_s1 = inlined_call_operand.hbm [shape: bf16[784,128], index: 1, kind: input, shape index: {}]   ;;  %s1299_s2 = inlined_call_operand.vmem [shape: f32[1,128], index: 2, kind: input, shape index: {}]   ;;  %s1300_s3 = inlined_call_operand.vmem [shape: bf16[128,128], index: 3, kind: input, shape index: {}]   ;;  %s1301_s4 = inlined_call_operand.vmem [shape: f32[1,128], index: 4, kind: input, shape index: {}]   ;;  %s1302_s5 = inlined_call_operand.vmem [shape: bf16[128,16], index: 5, kind: input, shape index: {}]   ;;  %s1303_s6 = inlined_call_operand.vmem [shape: f32[1,16], index: 6, kind: input, shape index: {}]   ;;  %s1304_s7 = inlined_call_operand.vmem [shape: f32[8,16], index: 7, kind: output, shape index: {}]  }
   0x1   :  { %s20_s25 = sshll.u32 %s1143_s24, 4  ;;  %s21_s25 = int_to_ptr.vmem [resolvable:$true] %s20_s25 }
   0x2   :  { %s1129_s26 = scalar_lea.vmem %s21_s25, 6272  ;;  %p1134_p1 = scmp.lt.s32.totalorder %s21_s25, %s21_s25 }
   0x3   :  { %p1130_p0 = scmp.ne.s32.totalorder %s21_s25, %s1129_s26  ;;  %p1135_p2 = scmp.lt.s32.totalorder %s1129_s26, %s1129_s26 }
   0x5   :  { %p1136_p3 = por %p1135_p2, %p1134_p1 }
   0x7   :  { %p1137_p4 = pnand %p1136_p3, %p1130_p0 }
   0x9   :  { %1140 = shalt.err (!%p1137_p4)
}
   0xa   :  { %s1144_s27 = smov 64   ;;  %s1145_s28 = smov 4  }
   0xb   :  { %26 = dma.hbm_to_vmem [thread:$0]  %s1298_s1, 6272, %s21_s25, [#allocation3], %s1144_s27, %s1144_s27, %s1145_s28  }
   0xc   :  { %1141 = dma.done.wait [#allocation3], 6272  }
   0xd   :  { %1142 = vsyncadd [#allocation3], 4294961024  ;;  %v1056_v0 = vld [vmem:[#allocation2 + $0x78] sm:$0xff]   ;;  %v1060_v4 = vld [vmem:[#allocation2 + $0x70] sm:$0xff]   ;;  %v1146_v44 = vmov 0.0   ;;  %vm1147_vm0 = vmmov 0  }
   0xe   :  { %v1057_v1 = vld [vmem:[#allocation2 + $0x38] sm:$0xff]   ;;  %919 = vmatprep.subr.bf16.mxu0 %v1056_v0  ;;  %v1061_v5 = vld [vmem:[#allocation2 + $0x30] sm:$0xff]   ;;  %v1064_v8 = vld [vmem:[#allocation2 + $0x68] sm:$0xff]   ;;  %vm454_vm1 = vcmask 130048  }
   0xf   :  { %v1058_v2 = vld [vmem:[#allocation2 + $0xf8] sm:$0xff]   ;;  %920 = vmatpush3.bf16.msra.mxu0 %v1057_v1  ;;  %v1062_v6 = vld [vmem:[#allocation2 + $0xf0] sm:$0xff]   ;;  %v1065_v9 = vld [vmem:[#allocation2 + $0x28] sm:$0xff]  }
  0x10   :  { %v1059_v3 = vld [vmem:[#allocation2 + $0xb8] sm:$0xff]   ;;  %941 = vmatprep.subr.bf16.mxu1 %v1058_v2  ;;  %921 = vmatprep.subr.bf16.mxu0 %v1060_v4  ;;  %v1063_v7 = vld [vmem:[#allocation2 + $0xb0] sm:$0xff]   ;;  %v1066_v10 = vld [vmem:[#allocation2 + $0xe8] sm:$0xff]  }
  0x11   :  { %942 = vmatpush3.bf16.msra.mxu1 %v1059_v3  ;;  %v1067_v11 = vld [vmem:[#allocation2 + $0xa8] sm:$0xff]   ;;  %v1068_v12 = vld [vmem:[#allocation2 + $0x60] sm:$0xff]   ;;  %v1072_v16 = vld [vmem:[#allocation2 + $0x58] sm:$0xff]  }
  0x12   :  { %943 = vmatprep.subr.bf16.mxu1 %v1062_v6  ;;  %v1069_v13 = vld [vmem:[#allocation2 + $0x20] sm:$0xff]   ;;  %v1073_v17 = vld [vmem:[#allocation2 + $0x18] sm:$0xff]   ;;  %v1076_v20 = vld [vmem:[#allocation2 + $0x50] sm:$0xff]  }
  0x13   :  { %922 = vmatpush3.bf16.msra.mxu0 %v1061_v5  ;;  %v1070_v14 = vld [vmem:[#allocation2 + $0xe0] sm:$0xff]   ;;  %v1074_v18 = vld [vmem:[#allocation2 + $0xd8] sm:$0xff]   ;;  %v1077_v21 = vld [vmem:[#allocation2 + $0x10] sm:$0xff]  }
  0x14   :  { %923 = vmatprep.subr.bf16.mxu0 %v1064_v8  ;;  %v1071_v15 = vld [vmem:[#allocation2 + $0xa0] sm:$0xff]   ;;  %v1075_v19 = vld [vmem:[#allocation2 + $0x98] sm:$0xff]   ;;  %v1078_v22 = vld [vmem:[#allocation2 + $0xd0] sm:$0xff]  }
  0x15   :  { %944 = vmatpush3.bf16.msra.mxu1 %v1063_v7  ;;  %v1079_v23 = vld [vmem:[#allocation2 + $0x90] sm:$0xff]   ;;  %v1080_v24 = vld [vmem:[#allocation2 + $0x48] sm:$0xff]   ;;  %v1084_v28 = vld [vmem:[#allocation2 + $0x40] sm:$0xff]  }
  0x16   :  { %945 = vmatprep.subr.bf16.mxu1 %v1066_v10  ;;  %v1081_v25 = vld [vmem:[#allocation2 + $0x8] sm:$0xff]   ;;  %v1085_v29 = vld [vmem:[#allocation2] sm:$0xff]   ;;  %v1088_v36 = vld [vmem:[#allocation2 + $0x178] sm:$0xff]  }
  0x17   :  { %924 = vmatpush3.bf16.msra.mxu0 %v1065_v9  ;;  %v1082_v26 = vld [vmem:[#allocation2 + $0xc8] sm:$0xff]   ;;  %v1086_v30 = vld [vmem:[#allocation2 + $0xc0] sm:$0xff]   ;;  %v44_v37 = vld [vmem:[%s1297_s0 + $0x18] sm:$0xff] }
  0x18   :  { %925 = vmatprep.subr.bf16.mxu0 %v1068_v12  ;;  %v1083_v27 = vld [vmem:[#allocation2 + $0x88] sm:$0xff]   ;;  %v1087_v33 = vld [vmem:[#allocation2 + $0x80] sm:$0xff]   ;;  %v51_v38 = vpack.c.bf16 %v44_v37, %v44_v37  ;;  %v1089_v39 = vld [vmem:[#allocation2 + $0x138] sm:$0xff]  }
  0x19   :  { %946 = vmatpush3.bf16.msra.mxu1 %v1067_v11  ;;  %v42_v31 = vld [vmem:[%s1297_s0 + $0x8] sm:$0xff]  ;;  %v41_v34 = vld [vmem:[%s1297_s0] sm:$0xff]  ;;  %v43_v40 = vld [vmem:[%s1297_s0 + $0x10] sm:$0xff] }
  0x1a   :  { %947 = vmatprep.subr.bf16.mxu1 %v1070_v14  ;;  %v49_v32 = vpack.c.bf16 %v42_v31, %v42_v31  ;;  %v48_v35 = vpack.c.bf16 %v41_v34, %v41_v34  ;;  %530 = vmatprep.mubr.bf16.mxu1 %v51_v38  ;;  %v50_v41 = vpack.c.bf16 %v43_v40, %v43_v40  ;;  %v1090_v42 = vld [vmem:[#allocation2 + $0x170] sm:$0xff]   ;;  %v1092_v45 = vld [vmem:[#allocation2 + $0x168] sm:$0xff]   ;;  %v1094_v47 = vld [vmem:[#allocation2 + $0x160] sm:$0xff]  }
  0x1b   :  { %926 = vmatpush3.bf16.msra.mxu0 %v1069_v13  ;;  %v1091_v43 = vld [vmem:[#allocation2 + $0x130] sm:$0xff]   ;;  %v1093_v46 = vld [vmem:[#allocation2 + $0x128] sm:$0xff]   ;;  %v1095_v48 = vld [vmem:[#allocation2 + $0x120] sm:$0xff]  }
  0x1c   :  { %927 = vmatprep.subr.bf16.mxu0 %v1072_v16  ;;  %490 = vmatprep.mubr.bf16.mxu0 %v49_v32  ;;  %v1096_v49 = vld [vmem:[#allocation2 + $0x158] sm:$0xff]   ;;  %v1098_v51 = vld [vmem:[#allocation2 + $0x150] sm:$0xff]   ;;  %v1104_v53 = vld [vmem:[#allocation2 + $0x180] sm:$0xff]  }
  0x1d   :  { %948 = vmatpush3.bf16.msra.mxu1 %v1071_v15  ;;  %v1097_v50 = vld [vmem:[#allocation2 + $0x118] sm:$0xff]   ;;  %v1099_v52 = vld [vmem:[#allocation2 + $0x110] sm:$0xff]   ;;  %v46_v54 = vld [vmem:[%s1297_s0 + $0x28] sm:$0xff] }
  0x1e   :  { %949 = vmatprep.subr.bf16.mxu1 %v1074_v18  ;;  %v1100_v55 = vld [vmem:[#allocation2 + $0x148] sm:$0xff]   ;;  %v53_v56 = vpack.c.bf16 %v46_v54, %v46_v54  ;;  %v47_v57 = vld [vmem:[%s1297_s0 + $0x30] sm:$0xff]  ;;  %v1102_v60 = vld [vmem:[#allocation2 + $0x140] sm:$0xff]  }
  0x1f   :  { %928 = vmatpush3.bf16.msra.mxu0 %v1073_v17  ;;  %v54_v58 = vpack.c.bf16 %v47_v57, %v47_v57  ;;  %v1101_v59 = vld [vmem:[#allocation2 + $0x108] sm:$0xff]   ;;  %v1103_v61 = vld [vmem:[#allocation2 + $0x100] sm:$0xff]   ;;  %v1105_v0 = vld [vmem:[%s1300_s3 + $0x38] sm:$0xff]  }
  0x20   :  { %929 = vmatprep.subr.bf16.mxu0 %v1076_v20  ;;  %v45_v62 = vld [vmem:[%s1297_s0 + $0x20] sm:$0xff]  ;;  %v1106_v1 = vld [vmem:[%s1300_s3 + $0x30] sm:$0xff]   ;;  %v1107_v2 = vld [vmem:[%s1300_s3 + $0x28] sm:$0xff]  }
  0x21   :  { %950 = vmatpush3.bf16.msra.mxu1 %v1075_v19  ;;  %v52_v63 = vpack.c.bf16 %v45_v62, %v45_v62  ;;  %v1108_v3 = vld [vmem:[%s1300_s3 + $0x20] sm:$0xff]   ;;  %v1109_v4 = vld [vmem:[%s1300_s3 + $0x18] sm:$0xff]   ;;  %v1110_v5 = vld [vmem:[%s1300_s3 + $0x10] sm:$0xff]  }
  0x22   :  { %951 = vmatprep.subr.bf16.mxu1 %v1078_v22  ;;  %v1111_v6 = vld [vmem:[%s1300_s3 + $0x8] sm:$0xff]   ;;  %v1112_v7 = vld [vmem:[%s1300_s3] sm:$0xff]   ;;  %v1113_v8 = vld [vmem:[%s1302_s5 + $0x38] sm:$0xff]  }
  0x23   :  { %930 = vmatpush3.bf16.msra.mxu0 %v1077_v21  ;;  %v1114_v9 = vld [vmem:[%s1302_s5 + $0x30] sm:$0xff]   ;;  %v1115_v10 = vld [vmem:[%s1302_s5 + $0x28] sm:$0xff]   ;;  %v1116_v11 = vld [vmem:[%s1302_s5 + $0x20] sm:$0xff]  }
  0x24   :  { %931 = vmatprep.subr.bf16.mxu0 %v1080_v24  ;;  %v1117_v12 = vld [vmem:[%s1302_s5 + $0x18] sm:$0xff]   ;;  %v1118_v13 = vld [vmem:[%s1302_s5 + $0x10] sm:$0xff]   ;;  %v1119_v40 = vld [vmem:[%s1302_s5 + $0x8] sm:$0xff]  }
  0x25   :  { %952 = vmatpush3.bf16.msra.mxu1 %v1079_v23 }
  0x26   :  { %953 = vmatprep.subr.bf16.mxu1 %v1082_v26 }
  0x27   :  { %932 = vmatpush3.bf16.msra.mxu0 %v1081_v25 }
  0x28   :  { %933 = vmatprep.subr.bf16.mxu0 %v1084_v28 }
  0x29   :  { %954 = vmatpush3.bf16.msra.mxu1 %v1083_v27  ;;  %v850_v27 = vld [vmem:[%s1299_s2] ss:$0 sm:$0xff] }
  0x2a   :  { %955 = vmatprep.subr.bf16.mxu1 %v1086_v30 }
  0x2b   :  { %934 = vmatpush3.bf16.msra.mxu0 %v1085_v29 }
  0x2c   :  { %963 = vmatprep.subr.bf16.mxu0 %v1088_v36 }
  0x2d   :  { %956 = vmatpush3.bf16.msra.mxu1 %v1087_v33 }
  0x2e   :  { %491 = vmatmul.mubr.bf16.vlgmr.msra.gmra.mxu0 %v48_v35  ;;  %1005 = vmatprep.subr.bf16.mxu1 %v1146_v44 }
  0x2f   :  { %964 = vmatpush3.bf16.msra.mxu0 %v1089_v39  ;;  %570 = vmatprep.mubr.bf16.mxu0 %v53_v56 }
  0x30   :  { %531 = vmatmul.mubr.bf16.vlgmr.msra.gmra.mxu1 %v50_v41  ;;  %965 = vmatprep.subr.bf16.mxu0 %v1090_v42  ;;  %v1120_v41 = vld [vmem:[%s1302_s5] sm:$0xff]  }
  0x31   :  { %1007 = vmatprep.mubr.msk.bf16.mxu1 %vm1147_vm0, %v1146_v44  ;;  %1006 = vmatpush3.bf16.msra.mxu1 %v1104_v53  ;;  %v901_v42 = vld [vmem:[%s1301_s4] ss:$0 sm:$0xff] }
  0x32   :  { %1011 = vmatprep.subr.bf16.mxu1 %v1146_v44 }
  0x33   :  { %966 = vmatpush3.bf16.msra.mxu0 %v1091_v43 }
  0x34   :  { %967 = vmatprep.subr.bf16.mxu0 %v1092_v45 }
  0x37   :  { %968 = vmatpush3.bf16.msra.mxu0 %v1093_v46 }
  0x38   :  { %969 = vmatprep.subr.bf16.mxu0 %v1094_v47  ;;  %1008 = vmatmul.mubr.msk.bf16.vlgmr.msra.gmra.mxu1 %vm454_vm1, %v54_v58 }
  0x39   :  { %1027 = vmatprep.mubr.msk.bf16.mxu1 %vm1147_vm0, %v1146_v44  ;;  %1012 = vmatpush3.bf16.msra.mxu1 %v1105_v0 }
  0x3a   :  { %1013 = vmatprep.subr.bf16.mxu1 %v1146_v44 }
  0x3b   :  { %970 = vmatpush3.bf16.msra.mxu0 %v1095_v48 }
  0x3c   :  { %971 = vmatprep.subr.bf16.mxu0 %v1096_v49 }
  0x3d   :  { %1014 = vmatpush3.bf16.msra.mxu1 %v1106_v1 }
  0x3e   :  { %1015 = vmatprep.subr.bf16.mxu1 %v1146_v44 }
  0x3f   :  { %972 = vmatpush3.bf16.msra.mxu0 %v1097_v50 }
  0x40   :  { %973 = vmatprep.subr.bf16.mxu0 %v1098_v51 }
  0x41   :  { %1016 = vmatpush3.bf16.msra.mxu1 %v1107_v2 }
  0x42   :  { %1017 = vmatprep.subr.bf16.mxu1 %v1146_v44 }
  0x43   :  { %974 = vmatpush3.bf16.msra.mxu0 %v1099_v52 }
  0x44   :  { %975 = vmatprep.subr.bf16.mxu0 %v1100_v55 }
  0x45   :  { %1018 = vmatpush3.bf16.msra.mxu1 %v1108_v3 }
  0x46   :  { %1019 = vmatprep.subr.bf16.mxu1 %v1146_v44 }
  0x47   :  { %976 = vmatpush3.bf16.msra.mxu0 %v1101_v59 }
  0x48   :  { %977 = vmatprep.subr.bf16.mxu0 %v1102_v60 }
  0x49   :  { %1020 = vmatpush3.bf16.msra.mxu1 %v1109_v4 }
  0x4a   :  { %1021 = vmatprep.subr.bf16.mxu1 %v1146_v44 }
  0x4b   :  { %978 = vmatpush3.bf16.msra.mxu0 %v1103_v61 }
  0x4c   :  { %1031 = vmatprep.subr.bf16.mxu0 %v1146_v44 }
  0x4d   :  { %1022 = vmatpush3.bf16.msra.mxu1 %v1110_v5 }
  0x4e   :  { %571 = vmatmul.mubr.bf16.vlgmr.msra.gmra.mxu0 %v52_v63  ;;  %1023 = vmatprep.subr.bf16.mxu1 %v1146_v44 }
  0x4f   :  { %1047 = vmatprep.mubr.msk.bf16.mxu0 %vm1147_vm0, %v1146_v44  ;;  %1032 = vmatpush3.bf16.msra.mxu0 %v1113_v8 }
  0x50   :  { %1033 = vmatprep.subr.bf16.mxu0 %v1146_v44 }
  0x51   :  { %1024 = vmatpush3.bf16.msra.mxu1 %v1111_v6 }
  0x52   :  { %1025 = vmatprep.subr.bf16.mxu1 %v1146_v44 }
  0x53   :  { %1034 = vmatpush3.bf16.msra.mxu0 %v1114_v9 }
  0x54   :  { %1035 = vmatprep.subr.bf16.mxu0 %v1146_v44 }
  0x55   :  { %1026 = vmatpush3.bf16.msra.mxu1 %v1112_v7 }
  0x57   :  { %1036 = vmatpush3.bf16.msra.mxu0 %v1115_v10 }
  0x58   :  { %1037 = vmatprep.subr.bf16.mxu0 %v1146_v44 }
  0x5b   :  { %1038 = vmatpush3.bf16.msra.mxu0 %v1116_v11 }
  0x5c   :  { %1039 = vmatprep.subr.bf16.mxu0 %v1146_v44 }
  0x5f   :  { %1040 = vmatpush3.bf16.msra.mxu0 %v1117_v12 }
  0x60   :  { %1041 = vmatprep.subr.bf16.mxu0 %v1146_v44 }
  0x63   :  { %1042 = vmatpush3.bf16.msra.mxu0 %v1118_v13 }
  0x64   :  { %1043 = vmatprep.subr.bf16.mxu0 %v1146_v44 }
  0x67   :  { %1044 = vmatpush3.bf16.msra.mxu0 %v1119_v40 }
  0x68   :  { %1045 = vmatprep.subr.bf16.mxu0 %v1146_v44  ;;  %v910_v44 = vld [vmem:[%s1303_s6] ss:$0 sm:$0xff] }
  0x6b   :  { %1046 = vmatpush3.bf16.msra.mxu0 %v1120_v41 }
  0xee   :  { %v935_v14 = vpop.f32.mrf.mxu0 }
  0xf0   :  { %v936_v15 = vpop.f32.mrf.mxu0  ;;  %v957_v16 = vpop.f32.mrf.mxu1 }
  0xf1   :  { %v937_v26 = vadd.f32 %v936_v15, %v935_v14 }
  0xf2   :  { %v938_v17 = vpop.f32.mrf.mxu0  ;;  %v958_v18 = vpop.f32.mrf.mxu1 }
  0xf3   :  { %v493_v28 = vadd.f32 %v937_v26, %v850_v27  ;;  %v959_v29 = vadd.f32 %v958_v18, %v957_v16 }
  0xf4   :  { %v939_v19 = vpop.f32.mrf.mxu0  ;;  %v960_v20 = vpop.f32.mrf.mxu1 }
  0xf5   :  { %v533_v32 = vadd.f32 %v959_v29, %v493_v28 }
  0xf6   :  { %v961_v21 = vpop.f32.mrf.mxu1 }
  0xf8   :  { %v612_v22 = vpop.f32.mrf.mxu1 }
  0xfa   :  { %v1009_v23 = vpop.f32.mrf.mxu1 }
  0xfc   :  { %v615_v24 = vpop.f32.mrf.mxu1 }
  0xfe   :  { %v1010_v25 = vpop.f32.mrf.mxu1 }
 0x10e   :  { %v979_v30 = vpop.f32.mrf.mxu0 }
 0x110   :  { %v980_v31 = vpop.f32.mrf.mxu0 }
 0x111   :  { %v981_v33 = vadd.f32 %v980_v31, %v979_v30 }
 0x112   :  { %v982_v34 = vpop.f32.mrf.mxu0 }
 0x113   :  { %v573_v35 = vadd.f32 %v981_v33, %v533_v32 }
 0x114   :  { %v983_v36 = vpop.f32.mrf.mxu0 }
 0x115   :  { %v613_v37 = vadd.f32 %v612_v22, %v573_v35 }
 0x117   :  { %v618_v38 = vmax.f32 %v613_v37, 0.0 }
 0x119   :  { %v619_v39 = vpack.c.bf16 %v618_v38, %v618_v38 }
 0x11b   :  { %1028 = vmatmul.mubr.bf16.vlgmr.msra.gmra.mxu1 %v619_v39 }
 0x1db   :  { %v725_v43 = vpop.f32.mrf.mxu1 }
 0x1dc   :  { %v726_v45 = vadd.f32 %v901_v42, %v725_v43 }
 0x1dd   :  { %v1029_v46 = vpop.f32.mrf.mxu1 }
 0x1de   :  { %v731_v47 = vmax.f32 %v726_v45, 0.0 }
 0x1df   :  { %v728_v48 = vpop.f32.mrf.mxu1 }
 0x1e0   :  { %v732_v49 = vpack.c.bf16 %v731_v47, %v731_v47 }
 0x1e1   :  { %v1030_v50 = vpop.f32.mrf.mxu1 }
 0x1e2   :  { %1048 = vmatmul.mubr.bf16.vlgmr.msra.gmra.mxu0 %v732_v49 }
 0x2a2   :  { %v838_v51 = vpop.f32.mrf.mxu0 }
 0x2a3   :  { %v839_v52 = vadd.f32 %v910_v44, %v838_v51 }
 0x2a4   :  { %v1049_v53 = vpop.f32.mrf.mxu0 }
 0x2a5   :  { %844 = vst.msk [vmem:[%s1304_s7] sm:$0xff] %vm454_vm1, %v839_v52 }
 0x2a6   :  { %v841_v54 = vpop.f32.mrf.mxu0 }
 0x2a8   :  { %v1050_v55 = vpop.f32.mrf.mxu0 }
 0x2a9   :  { %849 = vsyncpa [#allocation3], 1 }

</bundles_post_ra>
